<compile_context>
chip_gen: v7x
topology: tpu7x:2x2x1
jax: 0.10.0
libtpu: 0.0.40
codegen_flags: <defaults>
</compile_context>

<pallas_src>
import jax
import jax.numpy as jnp
from jax.experimental import pallas as pl
from jax.experimental.pallas import tpu as pltpu


def _vsparse_kernel(v_ref, vin_ref, w1a_ref, w1b_ref, b_ref, a_ref, o_ref):
    # v_ref/vin_ref/o_ref: (1, C, tm) VMEM tiles (channels on sublanes,
    # pixels on lanes).  w1a/w1b: (C, C) f32 in SMEM, b/a: (C,) f32 in SMEM.
    v = v_ref[0]          # (C, tm) f32
    vin = vin_ref[0]      # (C, tm) f32
    C, tm = v.shape

    # logit[p] = sum_o a[o] * relu( b[o] + sum_c w1a[o,c]*V[c,p] + w1b[o,c]*Vin[c,p] )
    # Fully unrolled over the (small) channel dims: scalar-from-SMEM broadcast
    # FMAs on full-width (1, tm) vregs; no concat copy, no MXU, no XLU reduce.
    logit = jnp.zeros((1, tm), dtype=jnp.float32)
    for o in range(C):
        acc = jnp.full((1, tm), b_ref[o], dtype=jnp.float32)
        for c in range(C):
            acc = acc + w1a_ref[o, c] * v[c:c + 1, :]
            acc = acc + w1b_ref[o, c] * vin[c:c + 1, :]
        logit = logit + a_ref[o] * jnp.maximum(acc, 0.0)

    gate = jax.nn.sigmoid(logit)                 # (1, tm)
    o_ref[0] = (gate * v).astype(o_ref.dtype)    # sublane broadcast over C


def v_sparse_forward(V, G, V_in, adp, W_w, W_b, a_w, *, tm=None):
    """V, V_in: (N, C, H, W) float32.  G, adp unused (parity with PyTorch forward).
    W_w: (C, 2C) 1x1-conv weight (out, in); W_b: (C,); a_w: (1, C)."""
    del G, adp
    N, C, H, Wd = V.shape
    HW = H * Wd

    # Large lane-dense pixel tile (multiple of 128).  Even at tm=2048 the
    # double-buffered footprint is 2 bufs x 3 arrays x C x tm x 4B, far below
    # the scoped VMEM default on v5e/v6e/v7x, so no vmem_limit override needed.
    if tm is None:
        tm = min(2048, ((HW + 127) // 128) * 128)
    HWp = ((HW + tm - 1) // tm) * tm

    # Free layout: NCHW is already channel-major -> (N, C, HW), no transpose.
    v3 = V.reshape(N, C, HW)
    vin3 = V_in.reshape(N, C, HW)
    if HWp != HW:
        pad = HWp - HW
        v3 = jnp.pad(v3, ((0, 0), (0, 0), (0, pad)))
        vin3 = jnp.pad(vin3, ((0, 0), (0, 0), (0, pad)))

    # Split the concat-matmul: first C input channels act on V, next C on V_in.
    w1a = W_w[:, :C]          # (C, C)
    w1b = W_w[:, C:]          # (C, C)
    bias = W_b.reshape(C)     # (C,)
    aw = a_w.reshape(C)       # (C,)

    grid = (N, HWp // tm)

    cost = pl.CostEstimate(
        flops=int(N * HWp * (4 * C * C + 4 * C)),
        transcendentals=int(N * HWp),
        bytes_accessed=int(3 * N * C * HWp * 4 + (2 * C * C + 2 * C) * 4),
    )

    out3 = pl.pallas_call(
        _vsparse_kernel,
        out_shape=jax.ShapeDtypeStruct((N, C, HWp), V.dtype),
        grid_spec=pltpu.PrefetchScalarGridSpec(
            num_scalar_prefetch=0,
            grid=grid,
            in_specs=[
                pl.BlockSpec((1, C, tm), lambda n, j: (n, 0, j)),   # V tile
                pl.BlockSpec((1, C, tm), lambda n, j: (n, 0, j)),   # V_in tile
                pl.BlockSpec(memory_space=pltpu.MemorySpace.SMEM),  # w1a
                pl.BlockSpec(memory_space=pltpu.MemorySpace.SMEM),  # w1b
                pl.BlockSpec(memory_space=pltpu.MemorySpace.SMEM),  # bias
                pl.BlockSpec(memory_space=pltpu.MemorySpace.SMEM),  # a weight
            ],
            out_specs=pl.BlockSpec((1, C, tm), lambda n, j: (n, 0, j)),
        ),
        compiler_params=pltpu.CompilerParams(
            dimension_semantics=("parallel", "parallel")),
        cost_estimate=cost,
    )(v3, vin3, w1a, w1b, bias, aw)

    out3 = out3[:, :, :HW]
    return out3.reshape(N, C, H, Wd)


def _reference(V, V_in, W_w, W_b, a_w):
    # pure-JAX reference of the same math (1x1 convs as einsums), for checking
    x = jnp.concatenate([V, V_in], axis=1)                        # (N, 2C, H, W)
    g = jnp.einsum('oc,nchw->nohw', W_w, x) + W_b[None, :, None, None]
    g = jnp.maximum(g, 0.0)
    logit = jnp.einsum('oc,nchw->nohw', a_w, g)                   # (N, 1, H, W)
    return jax.nn.sigmoid(logit) * V


if __name__ == "__main__":
    def run_case(key, N, C, H, Wd):
        ks = jax.random.split(key, 7)
        V = jax.random.normal(ks[0], (N, C, H, Wd), dtype=jnp.float32)
        V_in = jax.random.normal(ks[1], (N, C, H, Wd), dtype=jnp.float32)
        G = jax.random.normal(ks[2], (N, C, H, Wd), dtype=jnp.float32)   # unused
        adp = jax.random.normal(ks[3], (C, C), dtype=jnp.float32)        # unused
        W_w = 0.1 * jax.random.normal(ks[4], (C, 2 * C), dtype=jnp.float32)
        W_b = 0.1 * jax.random.normal(ks[5], (C,), dtype=jnp.float32)
        a_w = 0.1 * jax.random.normal(ks[6], (1, C), dtype=jnp.float32)

        out = jax.block_until_ready(
            v_sparse_forward(V, G, V_in, adp, W_w, W_b, a_w))
        ref = _reference(V, V_in, W_w, W_b, a_w)
        assert out.shape == (N, C, H, Wd)
        assert jnp.allclose(out, ref, atol=1e-5, rtol=1e-5)

    key = jax.random.PRNGKey(0)
    k1, k2 = jax.random.split(key)
    run_case(k1, 2, 4, 16, 16)   # spec config: conv_channels = 4
    run_case(k2, 1, 6, 8, 8)     # C not a multiple of 8: sublane-axis check

    print("KERNEL_OK")
</pallas_src>

<mosaic_0001>
module attributes {stable_mosaic.version = 11 : i64} {
  func.func @_vsparse_kernel(%arg0: i32, %arg1: i32, %arg2: memref<1x4x256xf32, #tpu.memory_space<vmem>>, %arg3: memref<1x4x256xf32, #tpu.memory_space<vmem>>, %arg4: memref<4x4xf32, #tpu.memory_space<smem>>, %arg5: memref<4x4xf32, #tpu.memory_space<smem>>, %arg6: memref<4xf32, #tpu.memory_space<smem>>, %arg7: memref<4xf32, #tpu.memory_space<smem>>, %arg8: memref<1x4x256xf32, #tpu.memory_space<vmem>>) attributes {dimension_semantics = [#tpu.dimension_semantics<parallel>, #tpu.dimension_semantics<parallel>], iteration_bounds = array<i64: 2, 1>, scalar_prefetch = 0 : i64, scratch_operands = 0 : i64, tpu.core_type = #tpu.core_type<tc>, window_params = [{transform_indices = @transform_0, window_bounds = array<i64: 1, 4, 256>}, {transform_indices = @transform_1, window_bounds = array<i64: 1, 4, 256>}, {transform_indices = @transform_2, window_bounds = array<i64: 4, 4>}, {transform_indices = @transform_3, window_bounds = array<i64: 4, 4>}, {transform_indices = @transform_4, window_bounds = array<i64: 4>}, {transform_indices = @transform_5, window_bounds = array<i64: 4>}, {transform_indices = @transform_6, window_bounds = array<i64: 1, 4, 256>}]} {
    %c0 = arith.constant 0 : index
    %c0_0 = arith.constant 0 : index
    %c0_1 = arith.constant 0 : index
    %0 = vector.load %arg2[%c0, %c0_0, %c0_1] : memref<1x4x256xf32, #tpu.memory_space<vmem>>, vector<1x4x256xf32>
    %1 = vector.shape_cast %0 : vector<1x4x256xf32> to vector<4x256xf32>
    %c0_2 = arith.constant 0 : index
    %c0_3 = arith.constant 0 : index
    %c0_4 = arith.constant 0 : index
    %2 = vector.load %arg3[%c0_2, %c0_3, %c0_4] : memref<1x4x256xf32, #tpu.memory_space<vmem>>, vector<1x4x256xf32>
    %3 = vector.shape_cast %2 : vector<1x4x256xf32> to vector<4x256xf32>
    %cst = arith.constant 0.000000e+00 : f32
    %4 = vector.broadcast %cst : f32 to vector<1x256xf32>
    %c0_5 = arith.constant 0 : index
    %5 = memref.load %arg6[%c0_5] : memref<4xf32, #tpu.memory_space<smem>>
    %6 = vector.broadcast %5 : f32 to vector<1x256xf32>
    %c0_6 = arith.constant 0 : index
    %c0_7 = arith.constant 0 : index
    %7 = memref.load %arg4[%c0_6, %c0_7] : memref<4x4xf32, #tpu.memory_space<smem>>
    %8 = vector.extract_strided_slice %1 {offsets = [0, 0], sizes = [1, 256], strides = [1, 1]} : vector<4x256xf32> to vector<1x256xf32>
    %9 = vector.broadcast %7 : f32 to vector<1x256xf32>
    %10 = arith.mulf %9, %8 : vector<1x256xf32>
    %11 = arith.addf %6, %10 : vector<1x256xf32>
    %c0_8 = arith.constant 0 : index
    %c0_9 = arith.constant 0 : index
    %12 = memref.load %arg5[%c0_8, %c0_9] : memref<4x4xf32, #tpu.memory_space<smem>>
    %13 = vector.extract_strided_slice %3 {offsets = [0, 0], sizes = [1, 256], strides = [1, 1]} : vector<4x256xf32> to vector<1x256xf32>
    %14 = vector.broadcast %12 : f32 to vector<1x256xf32>
    %15 = arith.mulf %14, %13 : vector<1x256xf32>
    %16 = arith.addf %11, %15 : vector<1x256xf32>
    %c0_10 = arith.constant 0 : index
    %c1 = arith.constant 1 : index
    %17 = memref.load %arg4[%c0_10, %c1] : memref<4x4xf32, #tpu.memory_space<smem>>
    %18 = vector.extract_strided_slice %1 {offsets = [1, 0], sizes = [1, 256], strides = [1, 1]} : vector<4x256xf32> to vector<1x256xf32>
    %19 = vector.broadcast %17 : f32 to vector<1x256xf32>
    %20 = arith.mulf %19, %18 : vector<1x256xf32>
    %21 = arith.addf %16, %20 : vector<1x256xf32>
    %c0_11 = arith.constant 0 : index
    %c1_12 = arith.constant 1 : index
    %22 = memref.load %arg5[%c0_11, %c1_12] : memref<4x4xf32, #tpu.memory_space<smem>>
    %23 = vector.extract_strided_slice %3 {offsets = [1, 0], sizes = [1, 256], strides = [1, 1]} : vector<4x256xf32> to vector<1x256xf32>
    %24 = vector.broadcast %22 : f32 to vector<1x256xf32>
    %25 = arith.mulf %24, %23 : vector<1x256xf32>
    %26 = arith.addf %21, %25 : vector<1x256xf32>
    %c0_13 = arith.constant 0 : index
    %c2 = arith.constant 2 : index
    %27 = memref.load %arg4[%c0_13, %c2] : memref<4x4xf32, #tpu.memory_space<smem>>
    %28 = vector.extract_strided_slice %1 {offsets = [2, 0], sizes = [1, 256], strides = [1, 1]} : vector<4x256xf32> to vector<1x256xf32>
    %29 = vector.broadcast %27 : f32 to vector<1x256xf32>
    %30 = arith.mulf %29, %28 : vector<1x256xf32>
    %31 = arith.addf %26, %30 : vector<1x256xf32>
    %c0_14 = arith.constant 0 : index
    %c2_15 = arith.constant 2 : index
    %32 = memref.load %arg5[%c0_14, %c2_15] : memref<4x4xf32, #tpu.memory_space<smem>>
    %33 = vector.extract_strided_slice %3 {offsets = [2, 0], sizes = [1, 256], strides = [1, 1]} : vector<4x256xf32> to vector<1x256xf32>
    %34 = vector.broadcast %32 : f32 to vector<1x256xf32>
    %35 = arith.mulf %34, %33 : vector<1x256xf32>
    %36 = arith.addf %31, %35 : vector<1x256xf32>
    %c0_16 = arith.constant 0 : index
    %c3 = arith.constant 3 : index
    %37 = memref.load %arg4[%c0_16, %c3] : memref<4x4xf32, #tpu.memory_space<smem>>
    %38 = vector.extract_strided_slice %1 {offsets = [3, 0], sizes = [1, 256], strides = [1, 1]} : vector<4x256xf32> to vector<1x256xf32>
    %39 = vector.broadcast %37 : f32 to vector<1x256xf32>
    %40 = arith.mulf %39, %38 : vector<1x256xf32>
    %41 = arith.addf %36, %40 : vector<1x256xf32>
    %c0_17 = arith.constant 0 : index
    %c3_18 = arith.constant 3 : index
    %42 = memref.load %arg5[%c0_17, %c3_18] : memref<4x4xf32, #tpu.memory_space<smem>>
    %43 = vector.extract_strided_slice %3 {offsets = [3, 0], sizes = [1, 256], strides = [1, 1]} : vector<4x256xf32> to vector<1x256xf32>
    %44 = vector.broadcast %42 : f32 to vector<1x256xf32>
    %45 = arith.mulf %44, %43 : vector<1x256xf32>
    %46 = arith.addf %41, %45 : vector<1x256xf32>
    %c0_19 = arith.constant 0 : index
    %47 = memref.load %arg7[%c0_19] : memref<4xf32, #tpu.memory_space<smem>>
    %cst_20 = arith.constant 0.000000e+00 : f32
    %48 = vector.broadcast %cst_20 : f32 to vector<1x256xf32>
    %49 = arith.maximumf %46, %48 : vector<1x256xf32>
    %50 = vector.broadcast %47 : f32 to vector<1x256xf32>
    %51 = arith.mulf %50, %49 : vector<1x256xf32>
    %52 = arith.addf %4, %51 : vector<1x256xf32>
    %c1_21 = arith.constant 1 : index
    %53 = memref.load %arg6[%c1_21] : memref<4xf32, #tpu.memory_space<smem>>
    %54 = vector.broadcast %53 : f32 to vector<1x256xf32>
    %c1_22 = arith.constant 1 : index
    %c0_23 = arith.constant 0 : index
    %55 = memref.load %arg4[%c1_22, %c0_23] : memref<4x4xf32, #tpu.memory_space<smem>>
    %56 = vector.extract_strided_slice %1 {offsets = [0, 0], sizes = [1, 256], strides = [1, 1]} : vector<4x256xf32> to vector<1x256xf32>
    %57 = vector.broadcast %55 : f32 to vector<1x256xf32>
    %58 = arith.mulf %57, %56 : vector<1x256xf32>
    %59 = arith.addf %54, %58 : vector<1x256xf32>
    %c1_24 = arith.constant 1 : index
    %c0_25 = arith.constant 0 : index
    %60 = memref.load %arg5[%c1_24, %c0_25] : memref<4x4xf32, #tpu.memory_space<smem>>
    %61 = vector.extract_strided_slice %3 {offsets = [0, 0], sizes = [1, 256], strides = [1, 1]} : vector<4x256xf32> to vector<1x256xf32>
    %62 = vector.broadcast %60 : f32 to vector<1x256xf32>
    %63 = arith.mulf %62, %61 : vector<1x256xf32>
    %64 = arith.addf %59, %63 : vector<1x256xf32>
    %c1_26 = arith.constant 1 : index
    %c1_27 = arith.constant 1 : index
    %65 = memref.load %arg4[%c1_26, %c1_27] : memref<4x4xf32, #tpu.memory_space<smem>>
    %66 = vector.extract_strided_slice %1 {offsets = [1, 0], sizes = [1, 256], strides = [1, 1]} : vector<4x256xf32> to vector<1x256xf32>
    %67 = vector.broadcast %65 : f32 to vector<1x256xf32>
    %68 = arith.mulf %67, %66 : vector<1x256xf32>
    %69 = arith.addf %64, %68 : vector<1x256xf32>
    %c1_28 = arith.constant 1 : index
    %c1_29 = arith.constant 1 : index
    %70 = memref.load %arg5[%c1_28, %c1_29] : memref<4x4xf32, #tpu.memory_space<smem>>
    %71 = vector.extract_strided_slice %3 {offsets = [1, 0], sizes = [1, 256], strides = [1, 1]} : vector<4x256xf32> to vector<1x256xf32>
    %72 = vector.broadcast %70 : f32 to vector<1x256xf32>
    %73 = arith.mulf %72, %71 : vector<1x256xf32>
    %74 = arith.addf %69, %73 : vector<1x256xf32>
    %c1_30 = arith.constant 1 : index
    %c2_31 = arith.constant 2 : index
    %75 = memref.load %arg4[%c1_30, %c2_31] : memref<4x4xf32, #tpu.memory_space<smem>>
    %76 = vector.extract_strided_slice %1 {offsets = [2, 0], sizes = [1, 256], strides = [1, 1]} : vector<4x256xf32> to vector<1x256xf32>
    %77 = vector.broadcast %75 : f32 to vector<1x256xf32>
    %78 = arith.mulf %77, %76 : vector<1x256xf32>
    %79 = arith.addf %74, %78 : vector<1x256xf32>
    %c1_32 = arith.constant 1 : index
    %c2_33 = arith.constant 2 : index
    %80 = memref.load %arg5[%c1_32, %c2_33] : memref<4x4xf32, #tpu.memory_space<smem>>
    %81 = vector.extract_strided_slice %3 {offsets = [2, 0], sizes = [1, 256], strides = [1, 1]} : vector<4x256xf32> to vector<1x256xf32>
    %82 = vector.broadcast %80 : f32 to vector<1x256xf32>
    %83 = arith.mulf %82, %81 : vector<1x256xf32>
    %84 = arith.addf %79, %83 : vector<1x256xf32>
    %c1_34 = arith.constant 1 : index
    %c3_35 = arith.constant 3 : index
    %85 = memref.load %arg4[%c1_34, %c3_35] : memref<4x4xf32, #tpu.memory_space<smem>>
    %86 = vector.extract_strided_slice %1 {offsets = [3, 0], sizes = [1, 256], strides = [1, 1]} : vector<4x256xf32> to vector<1x256xf32>
    %87 = vector.broadcast %85 : f32 to vector<1x256xf32>
    %88 = arith.mulf %87, %86 : vector<1x256xf32>
    %89 = arith.addf %84, %88 : vector<1x256xf32>
    %c1_36 = arith.constant 1 : index
    %c3_37 = arith.constant 3 : index
    %90 = memref.load %arg5[%c1_36, %c3_37] : memref<4x4xf32, #tpu.memory_space<smem>>
    %91 = vector.extract_strided_slice %3 {offsets = [3, 0], sizes = [1, 256], strides = [1, 1]} : vector<4x256xf32> to vector<1x256xf32>
    %92 = vector.broadcast %90 : f32 to vector<1x256xf32>
    %93 = arith.mulf %92, %91 : vector<1x256xf32>
    %94 = arith.addf %89, %93 : vector<1x256xf32>
    %c1_38 = arith.constant 1 : index
    %95 = memref.load %arg7[%c1_38] : memref<4xf32, #tpu.memory_space<smem>>
    %cst_39 = arith.constant 0.000000e+00 : f32
    %96 = vector.broadcast %cst_39 : f32 to vector<1x256xf32>
    %97 = arith.maximumf %94, %96 : vector<1x256xf32>
    %98 = vector.broadcast %95 : f32 to vector<1x256xf32>
    %99 = arith.mulf %98, %97 : vector<1x256xf32>
    %100 = arith.addf %52, %99 : vector<1x256xf32>
    %c2_40 = arith.constant 2 : index
    %101 = memref.load %arg6[%c2_40] : memref<4xf32, #tpu.memory_space<smem>>
    %102 = vector.broadcast %101 : f32 to vector<1x256xf32>
    %c2_41 = arith.constant 2 : index
    %c0_42 = arith.constant 0 : index
    %103 = memref.load %arg4[%c2_41, %c0_42] : memref<4x4xf32, #tpu.memory_space<smem>>
    %104 = vector.extract_strided_slice %1 {offsets = [0, 0], sizes = [1, 256], strides = [1, 1]} : vector<4x256xf32> to vector<1x256xf32>
    %105 = vector.broadcast %103 : f32 to vector<1x256xf32>
    %106 = arith.mulf %105, %104 : vector<1x256xf32>
    %107 = arith.addf %102, %106 : vector<1x256xf32>
    %c2_43 = arith.constant 2 : index
    %c0_44 = arith.constant 0 : index
    %108 = memref.load %arg5[%c2_43, %c0_44] : memref<4x4xf32, #tpu.memory_space<smem>>
    %109 = vector.extract_strided_slice %3 {offsets = [0, 0], sizes = [1, 256], strides = [1, 1]} : vector<4x256xf32> to vector<1x256xf32>
    %110 = vector.broadcast %108 : f32 to vector<1x256xf32>
    %111 = arith.mulf %110, %109 : vector<1x256xf32>
    %112 = arith.addf %107, %111 : vector<1x256xf32>
    %c2_45 = arith.constant 2 : index
    %c1_46 = arith.constant 1 : index
    %113 = memref.load %arg4[%c2_45, %c1_46] : memref<4x4xf32, #tpu.memory_space<smem>>
    %114 = vector.extract_strided_slice %1 {offsets = [1, 0], sizes = [1, 256], strides = [1, 1]} : vector<4x256xf32> to vector<1x256xf32>
    %115 = vector.broadcast %113 : f32 to vector<1x256xf32>
    %116 = arith.mulf %115, %114 : vector<1x256xf32>
    %117 = arith.addf %112, %116 : vector<1x256xf32>
    %c2_47 = arith.constant 2 : index
    %c1_48 = arith.constant 1 : index
    %118 = memref.load %arg5[%c2_47, %c1_48] : memref<4x4xf32, #tpu.memory_space<smem>>
    %119 = vector.extract_strided_slice %3 {offsets = [1, 0], sizes = [1, 256], strides = [1, 1]} : vector<4x256xf32> to vector<1x256xf32>
    %120 = vector.broadcast %118 : f32 to vector<1x256xf32>
    %121 = arith.mulf %120, %119 : vector<1x256xf32>
    %122 = arith.addf %117, %121 : vector<1x256xf32>
    %c2_49 = arith.constant 2 : index
    %c2_50 = arith.constant 2 : index
    %123 = memref.load %arg4[%c2_49, %c2_50] : memref<4x4xf32, #tpu.memory_space<smem>>
    %124 = vector.extract_strided_slice %1 {offsets = [2, 0], sizes = [1, 256], strides = [1, 1]} : vector<4x256xf32> to vector<1x256xf32>
    %125 = vector.broadcast %123 : f32 to vector<1x256xf32>
    %126 = arith.mulf %125, %124 : vector<1x256xf32>
    %127 = arith.addf %122, %126 : vector<1x256xf32>
    %c2_51 = arith.constant 2 : index
    %c2_52 = arith.constant 2 : index
    %128 = memref.load %arg5[%c2_51, %c2_52] : memref<4x4xf32, #tpu.memory_space<smem>>
    %129 = vector.extract_strided_slice %3 {offsets = [2, 0], sizes = [1, 256], strides = [1, 1]} : vector<4x256xf32> to vector<1x256xf32>
    %130 = vector.broadcast %128 : f32 to vector<1x256xf32>
    %131 = arith.mulf %130, %129 : vector<1x256xf32>
    %132 = arith.addf %127, %131 : vector<1x256xf32>
    %c2_53 = arith.constant 2 : index
    %c3_54 = arith.constant 3 : index
    %133 = memref.load %arg4[%c2_53, %c3_54] : memref<4x4xf32, #tpu.memory_space<smem>>
    %134 = vector.extract_strided_slice %1 {offsets = [3, 0], sizes = [1, 256], strides = [1, 1]} : vector<4x256xf32> to vector<1x256xf32>
    %135 = vector.broadcast %133 : f32 to vector<1x256xf32>
    %136 = arith.mulf %135, %134 : vector<1x256xf32>
    %137 = arith.addf %132, %136 : vector<1x256xf32>
    %c2_55 = arith.constant 2 : index
    %c3_56 = arith.constant 3 : index
    %138 = memref.load %arg5[%c2_55, %c3_56] : memref<4x4xf32, #tpu.memory_space<smem>>
    %139 = vector.extract_strided_slice %3 {offsets = [3, 0], sizes = [1, 256], strides = [1, 1]} : vector<4x256xf32> to vector<1x256xf32>
    %140 = vector.broadcast %138 : f32 to vector<1x256xf32>
    %141 = arith.mulf %140, %139 : vector<1x256xf32>
    %142 = arith.addf %137, %141 : vector<1x256xf32>
    %c2_57 = arith.constant 2 : index
    %143 = memref.load %arg7[%c2_57] : memref<4xf32, #tpu.memory_space<smem>>
    %cst_58 = arith.constant 0.000000e+00 : f32
    %144 = vector.broadcast %cst_58 : f32 to vector<1x256xf32>
    %145 = arith.maximumf %142, %144 : vector<1x256xf32>
    %146 = vector.broadcast %143 : f32 to vector<1x256xf32>
    %147 = arith.mulf %146, %145 : vector<1x256xf32>
    %148 = arith.addf %100, %147 : vector<1x256xf32>
    %c3_59 = arith.constant 3 : index
    %149 = memref.load %arg6[%c3_59] : memref<4xf32, #tpu.memory_space<smem>>
    %150 = vector.broadcast %149 : f32 to vector<1x256xf32>
    %c3_60 = arith.constant 3 : index
    %c0_61 = arith.constant 0 : index
    %151 = memref.load %arg4[%c3_60, %c0_61] : memref<4x4xf32, #tpu.memory_space<smem>>
    %152 = vector.extract_strided_slice %1 {offsets = [0, 0], sizes = [1, 256], strides = [1, 1]} : vector<4x256xf32> to vector<1x256xf32>
    %153 = vector.broadcast %151 : f32 to vector<1x256xf32>
    %154 = arith.mulf %153, %152 : vector<1x256xf32>
    %155 = arith.addf %150, %154 : vector<1x256xf32>
    %c3_62 = arith.constant 3 : index
    %c0_63 = arith.constant 0 : index
    %156 = memref.load %arg5[%c3_62, %c0_63] : memref<4x4xf32, #tpu.memory_space<smem>>
    %157 = vector.extract_strided_slice %3 {offsets = [0, 0], sizes = [1, 256], strides = [1, 1]} : vector<4x256xf32> to vector<1x256xf32>
    %158 = vector.broadcast %156 : f32 to vector<1x256xf32>
    %159 = arith.mulf %158, %157 : vector<1x256xf32>
    %160 = arith.addf %155, %159 : vector<1x256xf32>
    %c3_64 = arith.constant 3 : index
    %c1_65 = arith.constant 1 : index
    %161 = memref.load %arg4[%c3_64, %c1_65] : memref<4x4xf32, #tpu.memory_space<smem>>
    %162 = vector.extract_strided_slice %1 {offsets = [1, 0], sizes = [1, 256], strides = [1, 1]} : vector<4x256xf32> to vector<1x256xf32>
    %163 = vector.broadcast %161 : f32 to vector<1x256xf32>
    %164 = arith.mulf %163, %162 : vector<1x256xf32>
    %165 = arith.addf %160, %164 : vector<1x256xf32>
    %c3_66 = arith.constant 3 : index
    %c1_67 = arith.constant 1 : index
    %166 = memref.load %arg5[%c3_66, %c1_67] : memref<4x4xf32, #tpu.memory_space<smem>>
    %167 = vector.extract_strided_slice %3 {offsets = [1, 0], sizes = [1, 256], strides = [1, 1]} : vector<4x256xf32> to vector<1x256xf32>
    %168 = vector.broadcast %166 : f32 to vector<1x256xf32>
    %169 = arith.mulf %168, %167 : vector<1x256xf32>
    %170 = arith.addf %165, %169 : vector<1x256xf32>
    %c3_68 = arith.constant 3 : index
    %c2_69 = arith.constant 2 : index
    %171 = memref.load %arg4[%c3_68, %c2_69] : memref<4x4xf32, #tpu.memory_space<smem>>
    %172 = vector.extract_strided_slice %1 {offsets = [2, 0], sizes = [1, 256], strides = [1, 1]} : vector<4x256xf32> to vector<1x256xf32>
    %173 = vector.broadcast %171 : f32 to vector<1x256xf32>
    %174 = arith.mulf %173, %172 : vector<1x256xf32>
    %175 = arith.addf %170, %174 : vector<1x256xf32>
    %c3_70 = arith.constant 3 : index
    %c2_71 = arith.constant 2 : index
    %176 = memref.load %arg5[%c3_70, %c2_71] : memref<4x4xf32, #tpu.memory_space<smem>>
    %177 = vector.extract_strided_slice %3 {offsets = [2, 0], sizes = [1, 256], strides = [1, 1]} : vector<4x256xf32> to vector<1x256xf32>
    %178 = vector.broadcast %176 : f32 to vector<1x256xf32>
    %179 = arith.mulf %178, %177 : vector<1x256xf32>
    %180 = arith.addf %175, %179 : vector<1x256xf32>
    %c3_72 = arith.constant 3 : index
    %c3_73 = arith.constant 3 : index
    %181 = memref.load %arg4[%c3_72, %c3_73] : memref<4x4xf32, #tpu.memory_space<smem>>
    %182 = vector.extract_strided_slice %1 {offsets = [3, 0], sizes = [1, 256], strides = [1, 1]} : vector<4x256xf32> to vector<1x256xf32>
    %183 = vector.broadcast %181 : f32 to vector<1x256xf32>
    %184 = arith.mulf %183, %182 : vector<1x256xf32>
    %185 = arith.addf %180, %184 : vector<1x256xf32>
    %c3_74 = arith.constant 3 : index
    %c3_75 = arith.constant 3 : index
    %186 = memref.load %arg5[%c3_74, %c3_75] : memref<4x4xf32, #tpu.memory_space<smem>>
    %187 = vector.extract_strided_slice %3 {offsets = [3, 0], sizes = [1, 256], strides = [1, 1]} : vector<4x256xf32> to vector<1x256xf32>
    %188 = vector.broadcast %186 : f32 to vector<1x256xf32>
    %189 = arith.mulf %188, %187 : vector<1x256xf32>
    %190 = arith.addf %185, %189 : vector<1x256xf32>
    %c3_76 = arith.constant 3 : index
    %191 = memref.load %arg7[%c3_76] : memref<4xf32, #tpu.memory_space<smem>>
    %cst_77 = arith.constant 0.000000e+00 : f32
    %192 = vector.broadcast %cst_77 : f32 to vector<1x256xf32>
    %193 = arith.maximumf %190, %192 : vector<1x256xf32>
    %194 = vector.broadcast %191 : f32 to vector<1x256xf32>
    %195 = arith.mulf %194, %193 : vector<1x256xf32>
    %196 = arith.addf %148, %195 : vector<1x256xf32>
    %197 = arith.negf %196 : vector<1x256xf32>
    %198 = math.exp %197 : vector<1x256xf32>
    %cst_78 = arith.constant 1.000000e+00 : f32
    %199 = vector.broadcast %cst_78 : f32 to vector<1x256xf32>
    %200 = arith.addf %199, %198 : vector<1x256xf32>
    %201 = arith.divf %199, %200 : vector<1x256xf32>
    %202 = vector.broadcast %201 : vector<1x256xf32> to vector<4x256xf32>
    %203 = arith.mulf %202, %1 : vector<4x256xf32>
    %c0_79 = arith.constant 0 : index
    %c0_80 = arith.constant 0 : index
    %c0_81 = arith.constant 0 : index
    %204 = vector.load %arg8[%c0_79, %c0_80, %c0_81] : memref<1x4x256xf32, #tpu.memory_space<vmem>>, vector<1x4x256xf32>
    %205 = vector.shape_cast %204 : vector<1x4x256xf32> to vector<4x256xf32>
    %206 = vector.shape_cast %203 : vector<4x256xf32> to vector<1x4x256xf32>
    tpu.vector_store %arg8[%c0_79, %c0_80, %c0_81], %206 {strides = array<i32>} : memref<1x4x256xf32, #tpu.memory_space<vmem>>, vector<1x4x256xf32>,
    return
  }
  func.func @transform_0(%arg0: i32, %arg1: i32) -> (i32, i32, i32) {
    %c0_i32 = arith.constant 0 : i32
    %c0_i32_0 = arith.constant 0 : i32
    return %arg0, %c0_i32, %arg1 : i32, i32, i32
  }
  func.func @transform_1(%arg0: i32, %arg1: i32) -> (i32, i32, i32) {
    %c0_i32 = arith.constant 0 : i32
    %c0_i32_0 = arith.constant 0 : i32
    return %arg0, %c0_i32, %arg1 : i32, i32, i32
  }
  func.func @transform_2(%arg0: i32, %arg1: i32) -> (i32, i32) {
    %c0_i32 = arith.constant 0 : i32
    %c0_i32_0 = arith.constant 0 : i32
    %c0_i32_1 = arith.constant 0 : i32
    return %c0_i32, %c0_i32_0 : i32, i32
  }
  func.func @transform_3(%arg0: i32, %arg1: i32) -> (i32, i32) {
    %c0_i32 = arith.constant 0 : i32
    %c0_i32_0 = arith.constant 0 : i32
    %c0_i32_1 = arith.constant 0 : i32
    return %c0_i32, %c0_i32_0 : i32, i32
  }
  func.func @transform_4(%arg0: i32, %arg1: i32) -> i32 {
    %c0_i32 = arith.constant 0 : i32
    %c0_i32_0 = arith.constant 0 : i32
    return %c0_i32 : i32
  }
  func.func @transform_5(%arg0: i32, %arg1: i32) -> i32 {
    %c0_i32 = arith.constant 0 : i32
    %c0_i32_0 = arith.constant 0 : i32
    return %c0_i32 : i32
  }
  func.func @transform_6(%arg0: i32, %arg1: i32) -> (i32, i32, i32) {
    %c0_i32 = arith.constant 0 : i32
    %c0_i32_0 = arith.constant 0 : i32
    return %arg0, %c0_i32, %arg1 : i32, i32, i32
  }
}

</mosaic_0001>

<bundles_post_ra>
// kernel: tpu_custom_call.1
= control target key start
LH: loop header
LB: loop body
LE: loop exit
PB: predicated region body
PF: predicated region fallthrough
CT: control target
= control target key end

     0   :  { %s1740_s0 = inlined_call_operand.hbm [shape: f32[2,4,256], index: 0, kind: input, shape index: {}]   ;;  %s1741_s1 = inlined_call_operand.hbm [shape: f32[2,4,256], index: 1, kind: input, shape index: {}]   ;;  %s1742_s2 = inlined_call_operand.vmem [shape: f32[4,4], index: 2, kind: input, shape index: {}]   ;;  %s1743_s3 = inlined_call_operand.vmem [shape: f32[4,4], index: 3, kind: input, shape index: {}]   ;;  %s1744_s4 = inlined_call_operand.vmem [shape: f32[4], index: 4, kind: input, shape index: {}]   ;;  %s1745_s5 = inlined_call_operand.vmem [shape: f32[4], index: 5, kind: input, shape index: {}]   ;;  %s1746_s6 = inlined_call_operand.hbm [shape: f32[2,4,256], index: 6, kind: output, shape index: {}]  }
   0x1   :  { %1754 = sst [smem:[#allocation21_spill]] %s1740_s0 }
   0x2   :  { %1755 = sst [smem:[#allocation22_spill]] %s1741_s1 }
   0x3   :  { %1756 = sst [smem:[#allocation23_spill]] %s1742_s2 }
   0x4   :  { %1757 = sst [smem:[#allocation24_spill]] %s1743_s3 }
   0x5   :  { %11 = vsyncpa [#allocation3], 0 }
   0x6   :  { %13 = vsyncpa [#allocation3 + $0x1], 0 }
   0x7   :  { %14 = vsyncpa [#allocation7], 0 }
   0x8   :  { %16 = vsyncpa [#allocation7 + $0x1], 0 }
   0x9   :  { %17 = vsyncpa [#allocation5], 0 }
   0xa   :  { %18 = vsyncpa [#allocation10], 0 }
   0xb   :  { %19 = vsyncpa [#allocation13], 0 }
   0xc   :  { %20 = vsyncpa [#allocation4], 0 }
   0xd   :  { %22 = vsyncpa [#allocation4 + $0x1], 0  ;;  %s1306_s21 = smov 0   ;;  %s1308_s22 = smov 0  }
   0xe   :  { %s1310_s23 = smov 0   ;;  %s1312_s24 = smov 0  }
   0xf   :  { %s1314_s25 = smov 0   ;;  %s1316_s26 = smov 0  }
  0x10 LB: > { %s1758_s3 = sld [smem:[#allocation24_spill]]  ;;  %s840_s30 = sadd.s32 4294967295, %s1262_s26   ;;  %s1262_s26 = sphi %s1316_s26, %s28_s26   ;;  %s1258_s25 = sphi %s1314_s25, %s1783_s25   ;;  %s1254_s24 = sphi %s1312_s24, %s1782_s24   ;;  %s1250_s23 = sphi %s1310_s23, %s1781_s23   ;;  %s1246_s22 = sphi %s1308_s22, %s1780_s22   ;;  %s1242_s21 = sphi %s1306_s21, %s1779_s21  }
  0x11   : > { %p842_p0 = scmp.ge.s32.totalorder %s1262_s26, 1  ;;  %p1343_p1 = scmp.eq.s32.totalorder %s840_s30, 0 }
  0x12   : > { %p213_p2 = scmp.lt.s32.totalorder %s1262_s26, 3  ;;  %s1761_s2 = sld [smem:[#allocation23_spill]] }
  0x13   : > { %s1759_s7 = scalar_select %p1343_p1, 1, 0 }
  0x14   : > { %p1348_p3 = pnand %p842_p0, %p213_p2  ;;  %s248_s15 = sshll.u32 %s1744_s4, 4  ;;  %s1367_s15 = int_to_ptr.vmem [resolvable:$true] %s248_s15 }
  0x15   : > { %s259_s18 = sshll.u32 %s1745_s5, 4  ;;  %s260_s18 = int_to_ptr.vmem [resolvable:$true] %s259_s18 }
  0x16   : > { %s237_s29 = sshll.u32 %s1758_s3, 4  ;;  %p953_p5 = pneg %p1348_p3  ;;  %s238_s29 = int_to_ptr.vmem [resolvable:$true] %s237_s29 }
  0x17   : > { %s1760_s8 = scalar_select %p1348_p3, 1, 0 }
  0x18   : > { %s226_s11 = sshll.u32 %s1761_s2, 4  ;;  %p1360_p6 = pnand %p953_p5, %p1343_p1  ;;  %s227_s11 = int_to_ptr.vmem [resolvable:$true] %s226_s11 }
  0x19   : > { %s1044_s19 = scalar_lea.vmem %s238_s29, 64  ;;  %p1052_p11 = scmp.lt.s32.totalorder %s238_s29, %s238_s29 }
  0x1a   : > { %p1045_p7 = scmp.ne.s32.totalorder %s238_s29, %s1044_s19  ;;  %p1046_p8 = pneg %p1360_p6 }
  0x1b   : > { %p1053_p12 = scmp.lt.s32.totalorder %s1044_s19, %s1044_s19 }
  0x1c   : > { %p1047_p9 = pnand %p1046_p8, %p1045_p7 }
  0x1d   : > { %p1054_p13 = por %p1053_p12, %p1052_p11 }
  0x1e   : > { %p1048_p10 = pneg %p1047_p9 }
  0x20   : > { %p1055_p0 = pnand %p1054_p13, %p1048_p10 }
  0x22   : > { %1058 = shalt.err (!%p1055_p0)
}
  0x23   : > { %s1264_s20 = smov [#allocation9]   ;;  %s1059_s27 = scalar_lea.vmem %s227_s11, 64 }
  0x24   : > { %959 = dma.vmem_to_smem (!%p1360_p6), %s238_s29, 64, %s1264_s20, [#allocation10]  }
  0x25   : > { %p1060_p2 = scmp.ne.s32.totalorder %s227_s11, %s1059_s27  ;;  %p1067_p3 = scmp.lt.s32.totalorder %s227_s11, %s227_s11 }
  0x26   : > { %p1068_p1 = scmp.lt.s32.totalorder %s1059_s27, %s1059_s27 }
  0x27   : > { %p1062_p5 = pnand %p1060_p2, %p1046_p8 }
  0x28   : > { %p1069_p7 = por %p1068_p1, %p1067_p3 }
  0x29   : > { %p1063_p4 = pneg %p1062_p5 }
  0x2b   : > { %p1070_p9 = pnand %p1069_p7, %p1063_p4 }
  0x2d   : > { %1073 = shalt.err (!%p1070_p9)
}
  0x2e   : > { %s1265_s28 = smov [#allocation8]   ;;  %s1074_s29 = scalar_lea.vmem %s1367_s15, 16 }
  0x2f   : > { %956 = dma.vmem_to_smem (!%p1360_p6), %s227_s11, 64, %s1265_s28, [#allocation5]  }
  0x30   : > { %p1075_p10 = scmp.ne.s32.totalorder %s1367_s15, %s1074_s29  ;;  %p1082_p13 = scmp.lt.s32.totalorder %s1367_s15, %s1367_s15 }
  0x31   : > { %p1083_p0 = scmp.lt.s32.totalorder %s1074_s29, %s1074_s29 }
  0x32   : > { %p1077_p11 = pnand %p1075_p10, %p1046_p8 }
  0x33   : > { %p1084_p1 = por %p1083_p0, %p1082_p13 }
  0x34   : > { %p1078_p12 = pneg %p1077_p11 }
  0x36   : > { %p1085_p3 = pnand %p1084_p1, %p1078_p12 }
  0x38   : > { %1088 = shalt.err (!%p1085_p3)
}
  0x39   : > { %s1266_s9 = smov [#allocation11]   ;;  %s1089_s13 = scalar_lea.vmem %s260_s18, 16 }
  0x3a   : > { %962 = dma.vmem_to_smem (!%p1360_p6), %s1367_s15, 16, %s1266_s9, [#allocation10]  }
  0x3b   : > { %p1090_p4 = scmp.ne.s32.totalorder %s260_s18, %s1089_s13  ;;  %p1097_p7 = scmp.lt.s32.totalorder %s260_s18, %s260_s18 }
  0x3c   : > { %p1098_p9 = scmp.lt.s32.totalorder %s1089_s13, %s1089_s13 }
  0x3d   : > { %p1092_p2 = pnand %p1090_p4, %p1046_p8 }
  0x3e   : > { %p1099_p10 = por %p1098_p9, %p1097_p7 }
  0x3f   : > { %p1093_p5 = pneg %p1092_p2 }
  0x41   : > { %p1100_p11 = pnand %p1099_p10, %p1093_p5 }
  0x43   : > { %1103 = shalt.err (!%p1100_p11)
}
  0x44   : > { %s1267_s14 = smov [#allocation12]   ;;  %s841_s15 = sadd.s32 4294967294, %s1262_s26  }
  0x45   : > { %965 = dma.vmem_to_smem (!%p1360_p6), %s260_s18, 16, %s1267_s14, [#allocation13]  }
  0x46   : > { %s40_s16 = sadd.s32 1, %s1258_s25  ;;  %s49_s17 = sadd.s32 1, %s1250_s23 }
  0x47   : > { %p42_p8 = scmp.ge.s32.totalorder %s40_s16, 2  ;;  %p56_p12 = scmp.ne.s32.totalorder %s1250_s23, %s1246_s22 }
  0x48   : > { %p57_p13 = scmp.eq.s32.totalorder %s1262_s26, 0  ;;  %p62_p1 = scmp.ne.s32.totalorder %s1246_s22, %s1242_s21 }
  0x49   : > { %s1785_s16 = smov (%p42_p8, %s40_s16), 0  ;;  %p200_p6 = scmp.eq.s32.totalorder %s840_s30, 1 }
  0x4a   : > { %p1411_p0 = por %p57_p13, %p56_p12  ;;  %s44_s18 = ssub.s32 %s1258_s25, %s1785_s16 }
  0x4b   : > { %p47_p3 = scmp.eq.s32.totalorder %s44_s18, 0  ;;  %p1764_p4 = scmp.ne.s32.totalorder %s1759_s7, 0 }
  0x4c   : > { %p1427_p5 = por %p200_p6, %p56_p12  ;;  %p206_p7 = scmp.eq.s32.totalorder %s841_s15, 1 }
  0x4d   : > { %p1423_p2 = por %p1764_p4, %p62_p1  ;;  %p981_p10 = scmp.lt.s32.totalorder %s1262_s26, 2 }
  0x4e   : > { %s1766_s20 = scalar_select %p1427_p5, 1, 0 }
  0x4f   : > { %s1765_s19 = scalar_select %p1423_p2, 1, 0 }
  0x50   : > { %s1432_s27 = scalar_select %p47_p3, %s1250_s23, %s49_s17  }
  0x51   : > { %p1434_p9 = por %p206_p7, %p62_p1  ;;  %s1440_s29 = sand.u32 1, %s1250_s23  }
  0x52   : > { %s1751_s30 = sshll.u32 %s1258_s25, 7  ;;  %s1750_s9 = sshll.u32 %s1440_s29, 3 }
  0x53   : > { %s1767_s28 = scalar_select %p1434_p9, 1, 0 }
  0x54   : > { %s1768_s0 = sld [smem:[#allocation21_spill]]  ;;  %s274_s14 = scalar_lea.vmem [#allocation2], %s1750_s9 }
  0x55   : > { %s284_s15 = sshll.u32 %s274_s14, 4  ;;  %p1455_p11 = pnand %p981_p10, %p1411_p0  ;;  %s1459_s15 = int_to_ptr.vmem [resolvable:$true] %s284_s15 }
  0x56   : > { %s271_s18 = scalar_lea.sflag [#allocation3], %s1440_s29 }
  0x57   : > { %p1106_p12 = pneg %p1455_p11 }
  0x5a   : > { %s1449_s13 = scalar_lea.hbm %s1768_s0, %s1751_s30  ;;  %s1109_s12 = scalar_lea.hbm %s1768_s0, 256 }
  0x5b   : > { %s1104_s10 = scalar_lea.hbm %s1449_s13, 128  ;;  %p1110_p0 = scmp.lt.u32.totalorder %s1449_s13, %s1768_s0 }
  0x5c   : > { %p1105_p8 = scmp.ne.s32.totalorder %s1449_s13, %s1104_s10  ;;  %p1111_p6 = scmp.lt.u32.totalorder %s1109_s12, %s1104_s10 }
  0x5d   : > { %p1113_p4 = scmp.lt.u32.totalorder %s1104_s10, %s1449_s13 }
  0x5e   : > { %p1107_p13 = pnand %p1106_p12, %p1105_p8  ;;  %p1112_p3 = por %p1111_p6, %p1110_p0 }
  0x60   : > { %p1108_p1 = pneg %p1107_p13  ;;  %p1114_p7 = por %p1113_p4, %p1112_p3 }
  0x62   : > { %p1115_p10 = pnand %p1114_p7, %p1108_p1 }
  0x64   : > { %1118 = shalt.err (!%p1115_p10)
}
  0x65   : > { %s1119_s2 = scalar_lea.vmem %s1459_s15, 128  ;;  %s1268_s11 = smov [#allocation2]  }
  0x66   : > { %p1120_p8 = scmp.ne.s32.totalorder %s1459_s15, %s1119_s2  ;;  %s1124_s14 = sshll.u32 %s1268_s11, 4  ;;  %s1125_s14 = int_to_ptr.vmem [resolvable:$false] %s1124_s14 }
  0x67   : > { %s1126_s30 = scalar_lea.vmem %s1125_s14, 256  ;;  %p1127_p5 = scmp.lt.s32.totalorder %s1459_s15, %s1125_s14 }
  0x68   : > { %p1122_p13 = pnand %p1120_p8, %p1106_p12  ;;  %p1128_p0 = scmp.lt.s32.totalorder %s1126_s30, %s1119_s2 }
  0x6a   : > { %p1123_p9 = pneg %p1122_p13  ;;  %p1129_p6 = por %p1128_p0, %p1127_p5 }
  0x6c   : > { %p1130_p3 = pnand %p1129_p6, %p1123_p9 }
  0x6e   : > { %1133 = shalt.err (!%p1130_p3)
}
  0x6f   : > { %969 = dma.hbm_to_vmem [thread:$0]  (!%p1455_p11), %s1449_s13, 128, %s1459_s15, %s271_s18  }
  0x70   : > { %s1770_s9 = sshll.u32 %s1258_s25, 7  ;;  %s1771_s1 = sld [smem:[#allocation22_spill]] }
  0x71   : > { %s1772_s14 = sshll.u32 %s1440_s29, 3  ;;  %s292_s0 = scalar_lea.sflag [#allocation7], %s1440_s29 }
  0x72   : > { %s295_s2 = scalar_lea.vmem [#allocation6], %s1772_s14 }
  0x73   : > { %s305_s30 = sshll.u32 %s295_s2, 4  ;;  %s306_s30 = int_to_ptr.vmem [resolvable:$true] %s305_s30 }
  0x76   : > { %s1492_s11 = scalar_lea.hbm %s1771_s1, %s1770_s9  ;;  %s1139_s18 = scalar_lea.hbm %s1771_s1, 256 }
  0x77   : > { %s1134_s3 = scalar_lea.hbm %s1492_s11, 128  ;;  %p1140_p4 = scmp.lt.u32.totalorder %s1492_s11, %s1771_s1 }
  0x78   : > { %p1135_p5 = scmp.ne.s32.totalorder %s1492_s11, %s1134_s3  ;;  %p1141_p7 = scmp.lt.u32.totalorder %s1139_s18, %s1134_s3 }
  0x79   : > { %p1143_p8 = scmp.lt.u32.totalorder %s1134_s3, %s1492_s11 }
  0x7a   : > { %p1137_p9 = pnand %p1135_p5, %p1106_p12  ;;  %p1142_p10 = por %p1141_p7, %p1140_p4 }
  0x7c   : > { %p1138_p1 = pneg %p1137_p9  ;;  %p1144_p13 = por %p1143_p8, %p1142_p10 }
  0x7e   : > { %p1145_p0 = pnand %p1144_p13, %p1138_p1 }
  0x80   : > { %1148 = shalt.err (!%p1145_p0)
}
  0x81   : > { %s1149_s29 = scalar_lea.vmem %s306_s30, 128  ;;  %s1269_s12 = smov [#allocation6]  }
  0x82   : > { %p1150_p6 = scmp.ne.s32.totalorder %s306_s30, %s1149_s29  ;;  %s1154_s14 = sshll.u32 %s1269_s12, 4  ;;  %s1155_s14 = int_to_ptr.vmem [resolvable:$false] %s1154_s14 }
  0x83   : > { %s1156_s2 = scalar_lea.vmem %s1155_s14, 256  ;;  %p1157_p9 = scmp.lt.s32.totalorder %s306_s30, %s1155_s14 }
  0x84   : > { %p1152_p3 = pnand %p1150_p6, %p1106_p12  ;;  %p1158_p2 = scmp.lt.s32.totalorder %s1156_s2, %s1149_s29 }
  0x86   : > { %p1153_p5 = pneg %p1152_p3  ;;  %p1159_p4 = por %p1158_p2, %p1157_p9 }
  0x88   : > { %p1160_p7 = pnand %p1159_p4, %p1153_p5 }
  0x8a   : > { %1163 = shalt.err (!%p1160_p7)
}
  0x8b   : > { %972 = dma.hbm_to_vmem [thread:$0]  (!%p1455_p11), %s1492_s11, 128, %s306_s30, %s292_s0  }
  0x8c   : > { %p1773_p1 = scmp.ne.s32.totalorder %s1760_s8, 0 }
  0x8d   : > { %s1519_s3 = sand.u32 (!%p1773_p1), 1, %s1246_s22   ;;  %p1774_p2 = scmp.ne.s32.totalorder (!%p1773_p1), %s1765_s19, 0 }
  0x8e   : > { %314 = sbr.rel (%p1773_p1) target bundleno = 262 (0x106), region = 44  ;;  %s1522_s13 = sshll.u32 (!%p1773_p1), %s1519_s3, 3 }
  0x8f   : > { %s317_s15 = scalar_lea.sflag (!%p1773_p1), [#allocation3], %s1519_s3  ;;  %s320_s18 = scalar_lea.vmem (!%p1773_p1), [#allocation2], %s1522_s13 }
  0x95   : > { %1217 = dma.done.wait (%p1774_p2), %s317_s15, 128  }
  0x96   : > { %1219 = vsyncadd (%p1774_p2), %s317_s15, 4294967168  ;;  %s326_s0 = scalar_lea.sflag [#allocation7], %s1519_s3  ;;  %s329_s8 = scalar_lea.vmem [#allocation6], %s1522_s13 }
  0x97   : > { %1221 = dma.done.wait (%p1774_p2), %s326_s0, 128  }
  0x98   : > { %1223 = vsyncadd (%p1774_p2), %s326_s0, 4294967168  ;;  %p1775_p11 = scmp.ne.s32.totalorder %s1759_s7, 0 }
  0x9a   : > { %1225 = dma.done.wait (%p1775_p11), [#allocation5], 64  }
  0x9b   : > { %1227 = vsyncadd (%p1775_p11), [#allocation5], 4294967232 }
  0x9c   : > { %1229 = dma.done.wait (%p1775_p11), [#allocation10], 80  }
  0x9d   : > { %1231 = vsyncadd (%p1775_p11), [#allocation10], 4294967216 }
  0x9e   : > { %1233 = dma.done.wait (%p1775_p11), [#allocation13], 16  }
  0x9f   : > { %1235 = vsyncadd (%p1775_p11), [#allocation13], 4294967280 }
  0xa0   : > { %350 = sfence }
  0xa1   : > { %s1548_s19 = sld [smem:[#allocation11]]  ;;  %s862_s30 = sld [smem:[#allocation8 + $0x1]]  ;;  %v1554_v0 = vld [vmem:[%s320_s18] sm:$0xff]  ;;  %v1556_v1 = vld [vmem:[%s329_s8] sm:$0xff] }
  0xa2   : > { %s387_s17 = sld [smem:[#allocation8]]  ;;  %s864_s9 = sld [smem:[#allocation9 + $0x1]] }
  0xa3   : > { %s391_s11 = sld [smem:[#allocation9]]  ;;  %s866_s10 = sld [smem:[#allocation8 + $0x2]] }
  0xa4   : > { %s868_s29 = sld [smem:[#allocation9 + $0x2]]  ;;  %s1550_s12 = sld [smem:[#allocation8 + $0x3]] }
  0xa5   : > { %s1552_s14 = sld [smem:[#allocation9 + $0x3]]  ;;  %s1558_s7 = sld [smem:[#allocation11 + $0x1]] }
  0xa6   : > { %s1560_s2 = sld [smem:[#allocation8 + $0x80]]  ;;  %s1565_s0 = sld [smem:[#allocation8 + $0x81]] }
  0xa7   : > { %s1562_s15 = sld [smem:[#allocation9 + $0x80]]  ;;  %v386_v2 = vstv %s1548_s19  ;;  %s1567_s1 = sld [smem:[#allocation9 + $0x81]]  ;;  %v396_v7 = vstv %s862_s30 }
  0xa8   : > { %v388_v3 = vstv %s387_s17  ;;  %v404_v8 = vstv %s864_s9  ;;  %s1571_s18 = sld [smem:[#allocation8 + $0x82]]  ;;  %v397_v9 = vmul.f32 %v396_v7, %v1554_v0  ;;  %s1577_s19 = sld [smem:[#allocation8 + $0x83]] }
  0xa9   : > { %v392_v4 = vstv %s391_s11  ;;  %v389_v5 = vmul.f32 %v388_v3, %v1554_v0  ;;  %s1573_s8 = sld [smem:[#allocation9 + $0x82]]  ;;  %v405_v10 = vmul.f32 %v404_v8, %v1556_v1  ;;  %v412_v11 = vstv %s866_s10  ;;  %s1579_s17 = sld [smem:[#allocation9 + $0x83]] }
  0xaa   : > { %v393_v6 = vmul.f32 %v392_v4, %v1556_v1  ;;  %v420_v12 = vstv %s868_s29  ;;  %v413_v14 = vmul.f32 %v412_v11, %v1554_v0  ;;  %v428_v16 = vstv %s1550_s12  ;;  %s1588_s11 = sld [smem:[#allocation11 + $0x2]]  ;;  %s1590_s30 = sld [smem:[#allocation8 + $0x100]] }
  0xab   : > { %v390_v13 = vadd.f32 %v389_v5, %v386_v2  ;;  %v421_v15 = vmul.f32 %v420_v12, %v1556_v1  ;;  %v863_v17 = vrot.slane %v397_v9, 9  ;;  %v436_v18 = vstv %s1552_s14  ;;  %s1597_s9 = sld [smem:[#allocation9 + $0x100]]  ;;  %s1599_s10 = sld [smem:[#allocation8 + $0x101]] }
  0xac   : > { %v865_v20 = vrot.slane %v405_v10, 9  ;;  %v429_v21 = vmul.f32 %v428_v16, %v1554_v0  ;;  %v867_v22 = vrot.slane %v413_v14, 10  ;;  %v449_v24 = vstv %s1558_s7  ;;  %s1605_s29 = sld [smem:[#allocation9 + $0x101]]  ;;  %s1607_s12 = sld [smem:[#allocation8 + $0x102]] }
  0xad   : > { %v394_v19 = vadd.f32 %v393_v6, %v390_v13  ;;  %v869_v23 = vrot.slane %v421_v15, 10  ;;  %v451_v25 = vstv %s1560_s2  ;;  %v1593_v27 = vmul.f32 %v436_v18, %v1556_v1  ;;  %s1615_s14 = sld [smem:[#allocation9 + $0x102]]  ;;  %s1617_s7 = sld [smem:[#allocation8 + $0x103]] }
  0xae   : > { %v452_v28 = vmul.f32 %v451_v25, %v1554_v0  ;;  %v455_v29 = vstv %s1562_s15  ;;  %v459_v31 = vstv %s1565_s0  ;;  %v467_v32 = vstv %s1567_s1  ;;  %s1622_s1 = sld [smem:[#allocation9 + $0x103]]  ;;  %s1624_s2 = sld [smem:[#allocation12]] }
  0xaf   : > { %v402_v26 = vadd.f32 %v863_v17, %v394_v19  ;;  %v456_v30 = vmul.f32 %v455_v29, %v1556_v1  ;;  %v475_v33 = vstv %s1571_s18  ;;  %v460_v36 = vmul.f32 %v459_v31, %v1554_v0  ;;  %s1631_s15 = sld [smem:[#allocation11 + $0x3]]  ;;  %s1633_s0 = sld [smem:[#allocation8 + $0x180]] }
  0xb0   : > { %v453_v35 = vadd.f32 %v452_v28, %v449_v24  ;;  %v468_v37 = vmul.f32 %v467_v32, %v1556_v1  ;;  %v476_v38 = vmul.f32 %v475_v33, %v1554_v0  ;;  %v483_v39 = vstv %s1573_s8  ;;  %s1639_s18 = sld [smem:[#allocation9 + $0x180]]  ;;  %s1641_s8 = sld [smem:[#allocation8 + $0x181]] }
  0xb1   : > { %v410_v34 = vadd.f32 %v865_v20, %v402_v26  ;;  %v491_v40 = vstv %s1577_s19  ;;  %v499_v41 = vstv %s1579_s17  ;;  %v878_v44 = vrot.slane %v460_v36, 9  ;;  %s1644_s19 = sld [smem:[#allocation9 + $0x181]]  ;;  %s1650_s17 = sld [smem:[#allocation8 + $0x182]] }
  0xb2   : > { %v457_v43 = vadd.f32 %v456_v30, %v453_v35  ;;  %v880_v45 = vrot.slane %v468_v37, 9  ;;  %v871_v46 = vrot.slane %v429_v21, 11  ;;  %v484_v47 = vmul.f32 %v483_v39, %v1556_v1  ;;  %p1776_p10 = scmp.ne.s32.totalorder %s1766_s20, 0 }
  0xb3   : > { %v418_v42 = vadd.f32 %v867_v22, %v410_v34  ;;  %v492_v48 = vmul.f32 %v491_v40, %v1554_v0  ;;  %v873_v50 = vrot.slane %v1593_v27, 11  ;;  %v882_v52 = vrot.slane %v476_v38, 10 }
  0xb4   : > { %v465_v51 = vadd.f32 %v878_v44, %v457_v43  ;;  %v884_v53 = vrot.slane %v484_v47, 10  ;;  %v500_v54 = vmul.f32 %v499_v41, %v1556_v1  ;;  %v512_v55 = vstv %s1588_s11  ;;  %s1652_s11 = sld [smem:[#allocation9 + $0x182]] }
  0xb5   : > { %v426_v49 = vadd.f32 %v869_v23, %v418_v42  ;;  %v514_v56 = vstv %s1590_s30  ;;  %v886_v58 = vrot.slane %v492_v48, 11  ;;  %v518_v60 = vstv %s1597_s9  ;;  %s1656_s30 = sld [smem:[#allocation8 + $0x183]] }
  0xb6   : > { %v473_v57 = vadd.f32 %v880_v45, %v465_v51  ;;  %v515_v59 = vmul.f32 %v514_v56, %v1554_v0  ;;  %v519_v61 = vmul.f32 %v518_v60, %v1556_v1  ;;  %v522_v62 = vstv %s1599_s10  ;;  %s1660_s9 = sld [smem:[#allocation9 + $0x183]]  ;;  %s1662_s10 = sld [smem:[#allocation12 + $0x1]] }
  0xb7   : > { %v530_v63 = vstv %s1605_s29  ;;  %v538_v2 = vstv %s1607_s12  ;;  %v434_v3 = vadd.f32 %v871_v46, %v426_v49  ;;  %v523_v6 = vmul.f32 %v522_v62, %v1554_v0  ;;  %s905_s29 = sld [smem:[#allocation12 + $0x2]]  ;;  %s921_s12 = sld [smem:[#allocation12 + $0x3]] }
  0xb8   : > { %v481_v4 = vadd.f32 %v882_v52, %v473_v57  ;;  %v516_v5 = vadd.f32 %v515_v59, %v512_v55  ;;  %v531_v7 = vmul.f32 %v530_v63, %v1556_v1  ;;  %v539_v8 = vmul.f32 %v538_v2, %v1554_v0 }
  0xb9   : > { %v546_v9 = vstv %s1615_s14  ;;  %v554_v10 = vstv %s1617_s7  ;;  %v894_v13 = vrot.slane %v523_v6, 9  ;;  %v888_v14 = vrot.slane %v500_v54, 11  ;;  %s930_s14 = sshll.u32 %s1254_s24, 7  ;;  %s379_s7 = scalar_lea.vmem [#allocation14], %s1522_s13 }
  0xba   : > { %v489_v11 = vadd.f32 %v884_v53, %v481_v4  ;;  %v520_v12 = vadd.f32 %v519_v61, %v516_v5  ;;  %v896_v15 = vrot.slane %v531_v7, 9  ;;  %v547_v16 = vmul.f32 %v546_v9, %v1556_v1  ;;  %s1270_s24 = smov [#allocation14]  }
  0xbb   : > { %v555_v17 = vmul.f32 %v554_v10, %v1554_v0  ;;  %v898_v20 = vrot.slane %v539_v8, 10  ;;  %v562_v21 = vstv %s1622_s1  ;;  %v442_v22 = vadd.f32 %v873_v50, %v434_v3  ;;  %s689_s1 = sshll.u32 %s379_s7, 4  ;;  %s1168_s13 = sshll.u32 %s1270_s24, 4  ;;  %s1693_s1 = int_to_ptr.vmem [resolvable:$true] %s689_s1  ;;  %s1169_s13 = int_to_ptr.vmem [resolvable:$false] %s1168_s13 }
  0xbc   : > { %v497_v18 = vadd.f32 %v886_v58, %v489_v11  ;;  %v528_v19 = vadd.f32 %v894_v13, %v520_v12  ;;  %v445_v23 = vstv %s1624_s2  ;;  %v900_v24 = vrot.slane %v547_v16, 10  ;;  %p1171_p0 = scmp.lt.s32.totalorder %s1693_s1, %s1169_s13 }
  0xbd   : > { %v563_v26 = vmul.f32 %v562_v21, %v1556_v1  ;;  %v575_v27 = vstv %s1631_s15  ;;  %v577_v28 = vstv %s1633_s0  ;;  %v902_v29 = vrot.slane %v555_v17, 11  ;;  %s1691_s0 = scalar_lea.hbm %s1746_s6, %s930_s14 }
  0xbe   : > { %v536_v25 = vadd.f32 %v896_v15, %v528_v19  ;;  %v578_v30 = vmul.f32 %v577_v28, %v1554_v0  ;;  %v581_v31 = vstv %s1639_s18  ;;  %v585_v32 = vstv %s1641_s8  ;;  %s673_s18 = scalar_lea.sflag [#allocation4], %s1519_s3  ;;  %s1164_s8 = scalar_lea.vmem %s1693_s1, 128 }
  0xbf   : > { %v505_v33 = vadd.f32 %v888_v14, %v497_v18  ;;  %v582_v35 = vmul.f32 %v581_v31, %v1556_v1  ;;  %v586_v36 = vmul.f32 %v585_v32, %v1554_v0  ;;  %v593_v38 = vstv %s1644_s19  ;;  %p1165_p12 = scmp.ne.s32.totalorder %s1693_s1, %s1164_s8  ;;  %s1170_s19 = scalar_lea.vmem %s1169_s13, 256 }
  0xc0   : > { %v544_v34 = vadd.f32 %v898_v20, %v536_v25  ;;  %v579_v37 = vadd.f32 %v578_v30, %v575_v27  ;;  %v601_v39 = vstv %s1650_s17  ;;  %v609_v40 = vstv %s1652_s11  ;;  %p1172_p6 = scmp.lt.s32.totalorder %s1170_s19, %s1164_s8 }
  0xc1   : > { %v904_v42 = vrot.slane %v563_v26, 11  ;;  %v910_v43 = vrot.slane %v586_v36, 9  ;;  %v594_v44 = vmul.f32 %v593_v38, %v1556_v1  ;;  %v602_v46 = vmul.f32 %v601_v39, %v1554_v0  ;;  %p1166_p8 = pnand %p1165_p12, %p1776_p10 }
  0xc2   : > { %v552_v41 = vadd.f32 %v900_v24, %v544_v34  ;;  %v583_v45 = vadd.f32 %v582_v35, %v579_v37  ;;  %v610_v47 = vmul.f32 %v609_v40, %v1556_v1  ;;  %v617_v48 = vstv %s1656_s30  ;;  %p1173_p3 = por %p1172_p6, %p1171_p0 }
  0xc3   : > { %v444_v49 = vmax.f32 %v442_v22, 0.0  ;;  %v507_v50 = vmax.f32 %v505_v33, 0.0  ;;  %v912_v52 = vrot.slane %v594_v44, 9  ;;  %v914_v54 = vrot.slane %v602_v46, 10  ;;  %p1167_p13 = pneg %p1166_p8 }
  0xc4   : > { %v560_v51 = vadd.f32 %v902_v29, %v552_v41  ;;  %v591_v53 = vadd.f32 %v910_v43, %v583_v45  ;;  %v618_v55 = vmul.f32 %v617_v48, %v1554_v0  ;;  %v625_v56 = vstv %s1660_s9 }
  0xc5   : > { %v508_v57 = vstv %s1662_s10  ;;  %v916_v60 = vrot.slane %v610_v47, 10  ;;  %v626_v61 = vmul.f32 %v625_v56, %v1556_v1  ;;  %v446_v62 = vmul.f32 %v445_v23, %v444_v49  ;;  %p1174_p5 = pnand %p1173_p3, %p1167_p13 }
  0xc6   : > { %v568_v58 = vadd.f32 %v904_v42, %v560_v51  ;;  %v599_v59 = vadd.f32 %v912_v52, %v591_v53  ;;  %v509_v63 = vmul.f32 %v508_v57, %v507_v50  ;;  %v918_v4 = vrot.slane %v618_v55, 11 }
  0xc7   : > { %v571_v5 = vstv %s905_s29  ;;  %v920_v7 = vrot.slane %v626_v61, 11  ;;  %v634_v12 = vstv %s921_s12  ;;  %v644_v19 = vlaneseq }
  0xc8   : > { %v570_v2 = vmax.f32 %v568_v58, 0.0  ;;  %v607_v3 = vadd.f32 %v914_v54, %v599_v59  ;;  %v510_v8 = vadd.f32 %v509_v63, %v446_v62  ;;  %v663_v26 = vcombine.high %v1554_v0, %v1554_v0 }
  0xc9   : > { %v645_v20 = vshrl.u32 %v644_v19, 7 }
  0xca   : > { %v615_v6 = vadd.f32 %v916_v60, %v607_v3  ;;  %v572_v9 = vmul.f32 %v571_v5, %v570_v2 }
  0xcb   : > { %v646_v21 = vsub.s32 0, %v645_v20  ;;  %v650_v22 = vsub.s32 4, %v645_v20 }
  0xcc   : > { %v623_v10 = vadd.f32 %v918_v4, %v615_v6  ;;  %v573_v13 = vadd.f32 %v572_v9, %v510_v8 }
  0xce   : > { %v631_v11 = vadd.f32 %v920_v7, %v623_v10 }
  0xd0   : > { %v633_v14 = vmax.f32 %v631_v11, 0.0 }
  0xd2   : > { %v635_v15 = vmul.f32 %v634_v12, %v633_v14 }
  0xd4   : > { %v636_v16 = vadd.f32 %v635_v15, %v573_v13 }
  0xd6   : > { %v922_v1 = vmul.f32 -1.442695, %v636_v16 }
  0xd8   : > { %1040 = vpow2.f32 %v922_v1 }
  0xe2   : > { %v1041_v17 = vpop.eup %1040 }
  0xe3   : > { %v640_v18 = vadd.f32 1.0, %v1041_v17 }
  0xe5   : > { %1042 = vrcp.f32 %v640_v18 }
  0xef   : > { %v1043_v23 = vpop.eup %1042 }
  0xf0   : > { %v647_v24 = vrot.slane %v1043_v23, %v646_v21  ;;  %v651_v25 = vrot.slane %v1043_v23, %v650_v22 }
  0xf2   : > { %v657_v27 = vrot.slane %v647_v24, %v646_v21  ;;  %v661_v28 = vrot.slane %v651_v25, %v646_v21 }
  0xf4   : > { %v665_v29 = vmul.f32 %v657_v27, %v1554_v0  ;;  %v666_v30 = vmul.f32 %v663_v26, %v661_v28 }
  0xf6   : > { %v669_v31 = vcombine.low %v665_v29, %v666_v30 }
  0xf8   : > { %671 = vst [vmem:[%s379_s7] sm:$0xff] %v669_v31 }
  0xf9   : > { %1177 = shalt.err (!%p1174_p5)
}
  0xfa   : > { %s1178_s3 = scalar_lea.hbm %s1691_s0, 128  ;;  %s1182_s30 = scalar_lea.hbm %s1746_s6, 256 }
  0xfb   : > { %p1179_p9 = scmp.ne.s32.totalorder %s1691_s0, %s1178_s3  ;;  %p1183_p1 = scmp.lt.u32.totalorder %s1691_s0, %s1746_s6 }
  0xfc   : > { %p1184_p2 = scmp.lt.u32.totalorder %s1182_s30, %s1178_s3  ;;  %p1186_p12 = scmp.lt.u32.totalorder %s1178_s3, %s1691_s0 }
  0xfd   : > { %p1180_p4 = pnand %p1179_p9, %p1776_p10 }
  0xfe   : > { %p1185_p11 = por %p1184_p2, %p1183_p1 }
  0xff   : > { %p1181_p7 = pneg %p1180_p4 }
 0x100   : > { %p1187_p8 = por %p1186_p12, %p1185_p11 }
 0x102   : > { %p1188_p13 = pnand %p1187_p8, %p1181_p7 }
 0x104   : > { %1191 = shalt.err (!%p1188_p13)
}
 0x105   : > { %951 = dma.vmem_to_hbm [thread:$0]  (%p1776_p10), %s1693_s1, 128, %s1691_s0, %s673_s18  }
 0x106 PF: > { %s701_s29 = sand.u32 1, %s1242_s21   ;;  %p1777_p0 = scmp.ne.s32.totalorder %s1767_s28, 0 }
 0x107   : > { %p1778_p6 = scmp.ge.s32.totalorder %s1262_s26, 2  ;;  %s702_s12 = scalar_lea.sflag [#allocation4], %s701_s29 }
 0x109   : > { %p974_p3 = pnand %p1778_p6, %p1777_p0 }
 0x10b   : > { %1237 = dma.done.wait (!%p974_p3), %s702_s12, 128  }
 0x10c   : > { %1239 = vsyncadd (!%p974_p3), %s702_s12, 4294967168  ;;  %s28_s26 = sadd.s32 1, %s1262_s26   ;;  %s1779_s21 = smov %s1246_s22 }
 0x10d   : > { %p25_p5 = scmp.ge.s32.totalorder %s28_s26, 4   ;;  %s1780_s22 = smov %s1250_s23 }
 0x10e   : > { %s1781_s23 = smov %s1432_s27  ;;  %s1782_s24 = smov %s1258_s25 }
 0x10f   : > { %s1783_s25 = smov %s1785_s16  ;;  %27 = sbr.rel (!%p25_p5) target bundleno = 16 (0x10), region = 119 }
 0x116   :  { %707 = vsyncpa [#allocation3], 1 }
 0x117   :  { %709 = vsyncpa [#allocation3 + $0x1], 1 }
 0x118   :  { %710 = vsyncpa [#allocation7], 1 }
 0x119   :  { %712 = vsyncpa [#allocation7 + $0x1], 1 }
 0x11a   :  { %713 = vsyncpa [#allocation4], 1 }
 0x11b   :  { %715 = vsyncpa [#allocation4 + $0x1], 1 }
 0x11c   :  { %716 = vsyncpa [#allocation5], 1 }
 0x11d   :  { %718 = vsyncpa [#allocation5 + $0x1], 1 }
 0x11e   :  { %719 = vsyncpa [#allocation10], 1 }
 0x11f   :  { %720 = vsyncpa [#allocation13], 1 }

</bundles_post_ra>
